<compile_context>
chip_gen: v5e
topology: v5e:2x2
jax: 0.10.0
libtpu: 0.0.40
codegen_flags: <defaults>
</compile_context>

<pallas_src>
import jax
import jax.numpy as jnp
from jax import lax
from jax.experimental import pallas as pl
from jax.experimental.pallas import tpu as pltpu

_EPS = 1e-12            # matches torch.nn.functional.normalize default eps
_EPS_SQ = _EPS * _EPS   # rsqrt(max(sumsq, eps^2)) == 1 / max(||v||, eps)


def _round_up(v: int, m: int) -> int:
    return ((v + m - 1) // m) * m


def _cdiv(a: int, b: int) -> int:
    return (a + b - 1) // b


# --------------------------------------------------------------------------- kernels

def _normalize_anchor_cols_kernel(a_ref, o_ref):
    """L2-normalize each column of a (D, tc) tile of transposed anchors (run once)."""
    a = a_ref[...].astype(jnp.float32)
    sumsq = jnp.sum(a * a, axis=0, keepdims=True)
    inv = lax.rsqrt(jnp.maximum(sumsq, _EPS_SQ))        # == 1 / max(||col||, eps)
    o_ref[...] = (a * inv).astype(o_ref.dtype)


def _cosine_project_kernel(x_ref, anc_ref, o_ref, xn_ref):
    """One (row-tile, anchor-tile) block of the cosine relative projection.

    x_ref:   (tm, D)   input rows
    anc_ref: (D, ta)   pre-normalized, pre-transposed anchors
    o_ref:   (tm, ta)  cosine similarities
    xn_ref:  (tm, D)   VMEM scratch caching normalized rows across anchor tiles
    """
    @pl.when(pl.program_id(1) == 0)
    def _():
        x = x_ref[...].astype(jnp.float32)
        sumsq = jnp.sum(x * x, axis=-1, keepdims=True)
        inv = lax.rsqrt(jnp.maximum(sumsq, _EPS_SQ))    # EUP rsqrt == 1/max(norm, eps)
        xn_ref[...] = (x * inv).astype(xn_ref.dtype)

    sims = jnp.dot(xn_ref[...], anc_ref[...], preferred_element_type=jnp.float32)
    o_ref[...] = sims.astype(o_ref.dtype)


# --------------------------------------------------------------------------- sizing

def _vmem_capacity_bytes() -> int:
    try:
        cap = int(pltpu.get_tpu_info().vmem_capacity_bytes)
        if cap > 0:
            return cap
    except Exception:
        pass
    return 64 * 1024 * 1024     # v7x has the smallest VMEM -> safe fallback


def _tile_vmem_bytes(tm, ta, D, in_bytes, out_bytes):
    """Double-buffered I/O tiles + f32 intermediates (x copy, sims acc, x_n scratch)."""
    return (2 * tm * D * in_bytes          # x tile, double-buffered
            + 2 * D * ta * in_bytes        # anchor tile, double-buffered
            + 2 * tm * ta * out_bytes      # output tile, double-buffered
            + tm * D * 4                   # f32 copy of the x tile
            + tm * D * in_bytes            # x_n VMEM scratch
            + tm * ta * 4)                 # f32 sims before out-dtype cast


def _choose_tiles(N, A_pad, D, in_bytes, out_bytes, row_floor, ta_cap, budget):
    """ta divides A_pad (dense anchor blocks); prefer resident anchors (largest ta),
    then a 256-aligned row tile toward 512 rows, all under the VMEM budget."""
    avail = max(budget - (4 << 20), 8 << 20)           # compiler-scratch headroom
    cands = [c for c in range(128, A_pad + 1, 128)
             if A_pad % c == 0 and c <= ta_cap]
    cands.sort(reverse=True)
    if not cands:
        cands = [128]

    desired_tm = min(512, _round_up(max(N, row_floor), row_floor))
    good_tm = min(256, desired_tm)

    best = None
    for ta in cands:
        fixed = 2 * D * ta * in_bytes
        per_row = (2 * D * in_bytes + 2 * ta * out_bytes
                   + D * 4 + D * in_bytes + ta * 4)
        if avail <= fixed:
            continue
        tm_max = (avail - fixed) // per_row
        if tm_max < row_floor:
            continue
        tm = min(desired_tm, (tm_max // row_floor) * row_floor)
        if tm >= 256:
            tm = (tm // 256) * 256                     # 2x256x256 MXU alignment
        score = (tm >= good_tm, ta, tm)
        if best is None or score > best[0]:
            best = (score, tm, ta)
        if tm >= good_tm:
            break                                      # largest ta with a decent tm
    if best is None:
        return row_floor, cands[-1]
    return best[1], best[2]


def _balance_row_tiles(N, tm, row_floor):
    """Keep the number of row tiles even for small grids (v7x: 2 TensorCores share the
    'parallel' row axis); negligible cost on single-TC chips."""
    n = _cdiv(N, tm)
    if n % 2 == 1 and n <= 4 and N >= 2 * row_floor:
        tm2 = max(row_floor, _round_up(_cdiv(N, n + 1), row_floor))
        if _cdiv(N, tm2) % 2 == 0:
            return tm2
    return tm


# --------------------------------------------------------------------------- wrappers

def _normalize_anchors_t(a_t: jax.Array) -> jax.Array:
    """One-shot Pallas column-normalization of the transposed, padded anchors."""
    D, A_pad = a_t.shape
    in_bytes = jnp.dtype(a_t.dtype).itemsize
    tc = 128
    for cand in (1024, 512, 256, 128):
        if A_pad % cand == 0 and 4 * D * cand * in_bytes <= (16 << 20):
            tc = cand
            break
    vmem_limit = int(max(4 * D * tc * in_bytes + (8 << 20), 32 << 20))
    return pl.pallas_call(
        _normalize_anchor_cols_kernel,
        out_shape=jax.ShapeDtypeStruct((D, A_pad), a_t.dtype),
        grid_spec=pltpu.PrefetchScalarGridSpec(
            num_scalar_prefetch=0,
            grid=(A_pad // tc,),
            in_specs=[pl.BlockSpec((D, tc), lambda i: (0, i))],
            out_specs=pl.BlockSpec((D, tc), lambda i: (0, i)),
        ),
        compiler_params=pltpu.CompilerParams(
            dimension_semantics=("parallel",),
            vmem_limit_bytes=vmem_limit,
        ),
    )(a_t)


def relative_projector(x: jax.Array, anchors: jax.Array) -> jax.Array:
    """Pallas implementation of RelativeProjector.forward (cosine projection).

    x: [N, D], anchors: [A, D]  ->  [N, A]
    """
    N, D = x.shape
    A, D2 = anchors.shape
    assert D == D2, "feature dims of x and anchors must match"
    if anchors.dtype != x.dtype:
        anchors = anchors.astype(x.dtype)

    out_dtype = x.dtype
    in_bytes = jnp.dtype(x.dtype).itemsize
    out_bytes = jnp.dtype(out_dtype).itemsize
    row_floor = 16 if in_bytes < 4 else 8      # bf16 packs 2 rows per sublane

    # Anchor-count handling:
    #   A % 128 == 0 : dense output, nothing to slice.
    #   A < 128      : pad anchors to 128 -> lane-dense stores; slice the tiny output.
    #   otherwise    : no output padding; only the final anchor tile's stores are
    #                  lane-masked (ta capped so no block exceeds the output width).
    A_pad = _round_up(A, 128)
    if A % 128 == 0:
        out_cols, slice_cols, ta_cap = A, False, A_pad
    elif A < 128:
        out_cols, slice_cols, ta_cap = A_pad, True, A_pad
    else:
        out_cols, slice_cols, ta_cap = A, False, (A // 128) * 128

    # Normalize + transpose the anchors exactly once (hoisted out of the row loop);
    # the main kernel consumes them as the canonical (K, N) matmul operand.
    a_t = jnp.transpose(anchors)                         # (D, A): tiny one-time copy
    if A_pad != A:
        a_t = jnp.pad(a_t, ((0, 0), (0, A_pad - A)))     # zero cols -> zero similarities
    a_nt = _normalize_anchors_t(a_t)                     # (D, A_pad), unit columns

    capacity = _vmem_capacity_bytes()
    budget = min(max(int(capacity * 0.55), 24 << 20), 80 << 20)
    tm, ta = _choose_tiles(N, A_pad, D, in_bytes, out_bytes, row_floor, ta_cap, budget)
    tm = _balance_row_tiles(N, tm, row_floor)

    grid = (_cdiv(N, tm), A_pad // ta)   # anchor axis innermost -> x tile DMA reused

    vmem_limit = int(max(_tile_vmem_bytes(tm, ta, D, in_bytes, out_bytes) + (8 << 20),
                         32 << 20))

    out = pl.pallas_call(
        _cosine_project_kernel,
        out_shape=jax.ShapeDtypeStruct((N, out_cols), out_dtype),
        grid_spec=pltpu.PrefetchScalarGridSpec(
            num_scalar_prefetch=0,
            grid=grid,
            in_specs=[
                pl.BlockSpec((tm, D), lambda i, j: (i, 0)),
                pl.BlockSpec((D, ta), lambda i, j: (0, j)),
            ],
            out_specs=pl.BlockSpec((tm, ta), lambda i, j: (i, j)),
            scratch_shapes=[pltpu.VMEM((tm, D), x.dtype)],
        ),
        compiler_params=pltpu.CompilerParams(
            # anchor axis must be "arbitrary": x_n is cached at j == 0 and reused.
            dimension_semantics=("parallel", "arbitrary"),
            vmem_limit_bytes=vmem_limit,
        ),
    )(x, a_nt)

    return out[:, :A] if slice_cols else out


def relative_projector_ref(x, anchors):
    """Pure-JAX reference (mirrors the PyTorch forward with cosine projection)."""
    xf = x.astype(jnp.float32)
    af = anchors.astype(jnp.float32)
    x_n = xf / jnp.maximum(jnp.linalg.norm(xf, axis=-1, keepdims=True), _EPS)
    a_n = af / jnp.maximum(jnp.linalg.norm(af, axis=-1, keepdims=True), _EPS)
    return (x_n @ a_n.T).astype(x.dtype)


# TODO(synk): abs_transforms / rel_transforms are empty in the default RelativeProjector
# construction (pure metadata otherwise), so no tensor ops are translated for them.

if __name__ == "__main__":
    key = jax.random.PRNGKey(0)
    k1, k2, k3, k4, k5, k6 = jax.random.split(key, 6)

    # Case 1: small anchor count (A < 128) -> lane-dense padded output + tiny slice.
    N, D, A = 128, 64, 16
    x = jax.random.normal(k1, (N, D), dtype=jnp.float32)
    anchors = jax.random.normal(k2, (A, D), dtype=jnp.float32)
    out = jax.block_until_ready(relative_projector(x, anchors))
    ref = relative_projector_ref(x, anchors)
    assert out.shape == (N, A)
    assert jnp.allclose(out, ref, atol=1e-5, rtol=1e-5), "mismatch vs reference (case 1)"

    # Case 2: ragged N with A a multiple of 128 -> dense output, masked last row tile,
    # no padding/slicing anywhere.
    N2, D2, A2 = 100, 48, 256
    x2 = jax.random.normal(k3, (N2, D2), dtype=jnp.float32)
    anchors2 = jax.random.normal(k4, (A2, D2), dtype=jnp.float32)
    out2 = jax.block_until_ready(relative_projector(x2, anchors2))
    ref2 = relative_projector_ref(x2, anchors2)
    assert out2.shape == (N2, A2)
    assert jnp.allclose(out2, ref2, atol=1e-5, rtol=1e-5), "mismatch vs reference (case 2)"

    # Case 3: A > 128, not a multiple of 128 -> unpadded output, masked final anchor tile.
    N3, D3, A3 = 96, 64, 200
    x3 = jax.random.normal(k5, (N3, D3), dtype=jnp.float32)
    anchors3 = jax.random.normal(k6, (A3, D3), dtype=jnp.float32)
    out3 = jax.block_until_ready(relative_projector(x3, anchors3))
    ref3 = relative_projector_ref(x3, anchors3)
    assert out3.shape == (N3, A3)
    assert jnp.allclose(out3, ref3, atol=1e-5, rtol=1e-5), "mismatch vs reference (case 3)"

    print("KERNEL_OK")
</pallas_src>

<mosaic_0001>
module attributes {stable_mosaic.version = 11 : i64} {
  func.func @_normalize_anchor_cols_kernel(%arg0: i32, %arg1: memref<64x128xf32, #tpu.memory_space<vmem>>, %arg2: memref<64x128xf32, #tpu.memory_space<vmem>>) attributes {dimension_semantics = [#tpu.dimension_semantics<parallel>], iteration_bounds = array<i64: 1>, scalar_prefetch = 0 : i64, scratch_operands = 0 : i64, tpu.core_type = #tpu.core_type<tc>, window_params = [{transform_indices = @transform_0, window_bounds = array<i64: 64, 128>}, {transform_indices = @transform_1, window_bounds = array<i64: 64, 128>}]} {
    %c0 = arith.constant 0 : index
    %c0_0 = arith.constant 0 : index
    %0 = vector.load %arg1[%c0, %c0_0] : memref<64x128xf32, #tpu.memory_space<vmem>>, vector<64x128xf32>
    %1 = arith.mulf %0, %0 : vector<64x128xf32>
    %cst = arith.constant dense<0.000000e+00> : vector<128xf32>
    %2 = vector.multi_reduction <add>, %1, %cst [0] : vector<64x128xf32> to vector<128xf32>
    %3 = vector.shape_cast %2 : vector<128xf32> to vector<1x128xf32>
    %cst_1 = arith.constant 1.000000e-24 : f32
    %4 = vector.broadcast %cst_1 : f32 to vector<1x128xf32>
    %5 = arith.maximumf %3, %4 : vector<1x128xf32>
    %6 = math.rsqrt %5 : vector<1x128xf32>
    %7 = vector.broadcast %6 : vector<1x128xf32> to vector<64x128xf32>
    %8 = arith.mulf %0, %7 : vector<64x128xf32>
    %c0_2 = arith.constant 0 : index
    %c0_3 = arith.constant 0 : index
    %9 = vector.load %arg2[%c0_2, %c0_3] : memref<64x128xf32, #tpu.memory_space<vmem>>, vector<64x128xf32>
    tpu.vector_store %arg2[%c0_2, %c0_3], %8 {strides = array<i32>} : memref<64x128xf32, #tpu.memory_space<vmem>>, vector<64x128xf32>,
    return
  }
  func.func @transform_0(%arg0: i32) -> (i32, i32) {
    %c0_i32 = arith.constant 0 : i32
    %c0_i32_0 = arith.constant 0 : i32
    return %c0_i32, %arg0 : i32, i32
  }
  func.func @transform_1(%arg0: i32) -> (i32, i32) {
    %c0_i32 = arith.constant 0 : i32
    %c0_i32_0 = arith.constant 0 : i32
    return %c0_i32, %arg0 : i32, i32
  }
}

</mosaic_0001>

<bundles_post_ra>
// kernel: tpu_custom_call.1
= control target key start
LH: loop header
LB: loop body
LE: loop exit
PB: predicated region body
PF: predicated region fallthrough
CT: control target
= control target key end

     0   :  { %6 = vsyncpa [#allocation3], 0  ;;  %s184_s0 = inlined_call_operand.hbm [shape: f32[64,128], index: 0, kind: input, shape index: {}]   ;;  %s185_s1 = inlined_call_operand.hbm [shape: f32[64,128], index: 1, kind: output, shape index: {}]  }
   0x1   :  { %7 = vsyncpa [#allocation4], 0  ;;  %s12_s8 = sshll.u32 %s184_s0, 4  ;;  %s158_s9 = smov [#allocation2]   ;;  %s13_s8 = int_to_ptr.hbm [resolvable:$true] %s12_s8 }
   0x2   :  { %s14_s10 = sshll.u32 %s158_s9, 4  ;;  %s159_s11 = smov 128   ;;  %s15_s10 = int_to_ptr.vmem [resolvable:$true] %s14_s10 }
   0x3   :  { %s160_s12 = smov 8  }
   0x4   :  { %20 = dma.hbm_to_vmem [thread:$0]  %s13_s8, 1024, %s15_s10, [#allocation3], %s159_s11, %s159_s11, %s160_s12  }
   0x5   :  { %154 = dma.done.wait [#allocation3], 1024  }
   0x6   :  { %155 = vsyncadd [#allocation3], 4294966272  ;;  %v25_v0 = vld [vmem:[#allocation2] sm:$0xff]  ;;  %v26_v1 = vld [vmem:[#allocation2 + $0x8] sm:$0xff]  ;;  %s161_s0 = smov [#allocation5]   ;;  %s87_s16 = sshll.u32 %s185_s1, 4  ;;  %s88_s16 = int_to_ptr.hbm [resolvable:$true] %s87_s16 }
   0x7   :  { %v27_v2 = vld [vmem:[#allocation2 + $0x10] sm:$0xff]  ;;  %v28_v3 = vld [vmem:[#allocation2 + $0x18] sm:$0xff]  ;;  %v33_v4 = vmul.f32 %v25_v0, %v25_v0  ;;  %v34_v5 = vmul.f32 %v26_v1, %v26_v1  ;;  %v29_v7 = vld [vmem:[#allocation2 + $0x20] sm:$0xff]  ;;  %s85_s13 = sshll.u32 %s161_s0, 4  ;;  %s86_s13 = int_to_ptr.vmem [resolvable:$true] %s85_s13 }
   0x8   :  { %v35_v6 = vmul.f32 %v27_v2, %v27_v2  ;;  %v36_v8 = vmul.f32 %v28_v3, %v28_v3  ;;  %v30_v10 = vld [vmem:[#allocation2 + $0x28] sm:$0xff]  ;;  %v37_v11 = vmul.f32 %v29_v7, %v29_v7  ;;  %v31_v13 = vld [vmem:[#allocation2 + $0x30] sm:$0xff]  ;;  %v32_v16 = vld [vmem:[#allocation2 + $0x38] sm:$0xff] }
   0x9   :  { %v41_v9 = vadd.f32 %v34_v5, %v33_v4  ;;  %v38_v14 = vmul.f32 %v30_v10, %v30_v10  ;;  %v39_v17 = vmul.f32 %v31_v13, %v31_v13  ;;  %v40_v19 = vmul.f32 %v32_v16, %v32_v16 }
   0xb   :  { %v42_v12 = vadd.f32 %v41_v9, %v35_v6 }
   0xd   :  { %v43_v15 = vadd.f32 %v42_v12, %v36_v8 }
   0xf   :  { %v44_v18 = vadd.f32 %v43_v15, %v37_v11 }
  0x11   :  { %v45_v20 = vadd.f32 %v44_v18, %v38_v14 }
  0x13   :  { %v46_v21 = vadd.f32 %v45_v20, %v39_v17 }
  0x15   :  { %v47_v22 = vadd.f32 %v46_v21, %v40_v19 }
  0x17   :  { %v48_v23 = vrot.slane %v47_v22, 4 }
  0x19   :  { %v49_v24 = vadd.f32 %v48_v23, %v47_v22 }
  0x1b   :  { %v50_v25 = vrot.slane %v49_v24, 2 }
  0x1d   :  { %v51_v26 = vadd.f32 %v50_v25, %v49_v24 }
  0x1f   :  { %v52_v27 = vrot.slane %v51_v26, 1 }
  0x21   :  { %v53_v28 = vadd.f32 %v52_v27, %v51_v26 }
  0x23   :  { %v54_v29 = vmax.f32 %v53_v28, 1e-24 }
  0x25   :  { %104 = vrsqrt.f32 %v54_v29  ;;  %vm61_vm0 = vweird.f32 %v54_v29 }
  0x2b   :  { %v105_v30 = vpop.eup %104 }
  0x2c   :  { %v56_v31 = vmul.f32 %v105_v30, %v54_v29  ;;  %vm62_vm1 = vweird.f32 %v105_v30 }
  0x2d   :  { %vm63_vm2 = vmor %vm61_vm0, %vm62_vm1 }
  0x2e   :  { %v57_v32 = vmul.f32 %v105_v30, %v56_v31 }
  0x30   :  { %v58_v33 = vmul.f32 0.5, %v57_v32 }
  0x32   :  { %v59_v34 = vsub.f32 1.5, %v58_v33 }
  0x34   :  { %v60_v35 = vmul.f32 %v105_v30, %v59_v34 }
  0x36   :  { %v64_v36 = vsel %vm63_vm2, %v105_v30, %v60_v35 }
  0x37   :  { %v65_v37 = vmul.f32 %v64_v36, %v25_v0  ;;  %v66_v38 = vmul.f32 %v64_v36, %v26_v1  ;;  %v67_v39 = vmul.f32 %v64_v36, %v27_v2  ;;  %v68_v40 = vmul.f32 %v64_v36, %v28_v3 }
  0x38   :  { %v69_v41 = vmul.f32 %v64_v36, %v29_v7  ;;  %v70_v42 = vmul.f32 %v64_v36, %v30_v10  ;;  %v71_v43 = vmul.f32 %v64_v36, %v31_v13  ;;  %v72_v44 = vmul.f32 %v64_v36, %v32_v16 }
  0x39   :  { %73 = vst [vmem:[#allocation5] sm:$0xff] %v65_v37 }
  0x3a   :  { %74 = vst [vmem:[#allocation5 + $0x8] sm:$0xff] %v66_v38 }
  0x3b   :  { %75 = vst [vmem:[#allocation5 + $0x10] sm:$0xff] %v67_v39 }
  0x3c   :  { %76 = vst [vmem:[#allocation5 + $0x18] sm:$0xff] %v68_v40 }
  0x3d   :  { %77 = vst [vmem:[#allocation5 + $0x20] sm:$0xff] %v69_v41 }
  0x3e   :  { %78 = vst [vmem:[#allocation5 + $0x28] sm:$0xff] %v70_v42 }
  0x3f   :  { %79 = vst [vmem:[#allocation5 + $0x30] sm:$0xff] %v71_v43 }
  0x40   :  { %80 = vst [vmem:[#allocation5 + $0x38] sm:$0xff] %v72_v44 }
  0x41   :  { %93 = dma.vmem_to_hbm [thread:$0]  %s86_s13, 1024, %s88_s16, [#allocation4], %s159_s11, %s159_s11, %s160_s12  }
  0x42   :  { %156 = dma.done.wait [#allocation4], 1024  }
  0x43   :  { %157 = vsyncadd [#allocation4], 4294966272 }
  0x44   :  { %98 = vsyncpa [#allocation3], 1 }
  0x45   :  { %99 = vsyncpa [#allocation4], 1 }

</bundles_post_ra>
